<compile_context>
chip_gen: v7x
topology: tpu7x:2x2x1
jax: 0.10.0
libtpu: 0.0.40
codegen_flags: <defaults>
</compile_context>

<pallas_src>
import functools

import jax
import jax.numpy as jnp
from jax.experimental import pallas as pl
from jax.experimental.pallas import tpu as pltpu


def _round_up(x, m):
    return ((x + m - 1) // m) * m


def _spoc_kernel(x_ref, o_ref, acc_ref, *, inv_hw, hw_total, hw_chunk, need_mask):
    # x_ref: (TB, C, HW_CHUNK) VMEM tile; o_ref: (TB, C); acc_ref: (TB, C) f32.
    k = pl.program_id(1)

    @pl.when(k == 0)
    def _():
        acc_ref[...] = jnp.zeros_like(acc_ref)

    x = x_ref[...]
    if need_mask:
        # Ragged last HW chunk: zero the out-of-range lanes so the undefined
        # padding Pallas reads into the block never reaches the accumulator.
        lane = jax.lax.broadcasted_iota(jnp.int32, x.shape, dimension=x.ndim - 1)
        x = jnp.where(k * hw_chunk + lane < hw_total, x, jnp.zeros_like(x))

    # f32 accumulation fused into the reduction (no full f32 copy of the tile).
    acc_ref[...] += jnp.sum(x, axis=-1, dtype=jnp.float32)

    @pl.when(k == pl.num_programs(1) - 1)
    def _():
        o_ref[...] = (acc_ref[...] * inv_hw).astype(o_ref.dtype)


def spoc_pallas(x, *, max_batch_block=64):
    """SPoC descriptor: x (N, C, H, W) -> (N, C) global average pool.

    Matches torch.flatten(F.avg_pool2d(x, (H, W)), 1).
    """
    n, c, h, w = x.shape
    hw = h * w
    in_dtype = x.dtype
    out_dtype = x.dtype
    itemsize = jnp.dtype(in_dtype).itemsize
    out_itemsize = jnp.dtype(out_dtype).itemsize

    # Per-generation VMEM budget for the double-buffered input block
    # (~35% of capacity, capped) — fits v5e/v6e (128 MiB) and v7x (64 MiB).
    try:
        vmem_capacity = int(pltpu.get_tpu_info().vmem_capacity_bytes)
    except Exception:  # conservative fallback
        vmem_capacity = 64 * 1024 * 1024
    input_budget = min((vmem_capacity * 35) // 100, 48 * 1024 * 1024)

    # Padded VMEM layout: HW (lane axis) pads to 128, C (sublane axis) pads to
    # the dtype's sublane pack (8 for f32, 16 for bf16, 32 for int8).
    pack = max(8, 32 // itemsize)
    c_pad = _round_up(c, pack)
    tb_min = n if n < 8 else 8

    # Spatial chunking: only if even the minimal batch block would blow the
    # budget with the full HW extent (required for big feature maps on v7x).
    full_row_bytes = c_pad * _round_up(hw, 128) * itemsize
    if 2 * tb_min * full_row_bytes <= input_budget:
        hw_chunk = hw
    else:
        max_lanes = input_budget // (2 * tb_min * c_pad * itemsize)
        hw_chunk = max(128, (max_lanes // 128) * 128)  # multiple of 128 lanes
        if hw_chunk >= hw:
            hw_chunk = hw
    num_hw_chunks = pl.cdiv(hw, hw_chunk)
    need_mask = (num_hw_chunks > 1) and (hw % hw_chunk != 0)

    row_bytes = c_pad * _round_up(hw_chunk, 128) * itemsize

    # Batch block: biggest that fits the budget, sublane-aligned, and leaving
    # >= 2 batch grid steps when possible (v7x megacore sharding).
    tb = max(1, input_budget // (2 * row_bytes))
    tb = min(tb, max_batch_block, n)
    if n <= 8:
        tb = n  # full-dim block is always layout-legal
    else:
        tb = max(8, (tb // 8) * 8)
        half = _round_up(pl.cdiv(n, 2), 8)
        if half < n:
            tb = min(tb, half)

    grid = (pl.cdiv(n, tb), num_hw_chunks)

    # Free (contiguous) reshape NCHW -> (N, C, HW); no batch padding.
    x_flat = x.reshape(n, c, hw)

    # Explicit VMEM limit from the *padded* block footprints so Mosaic never
    # rejects the block (2x input double-buffer + 2x output + accumulator).
    in_block_bytes = tb * c_pad * _round_up(hw_chunk, 128) * itemsize
    out_pack = max(8, 32 // out_itemsize)
    out_block_bytes = _round_up(tb, out_pack) * _round_up(c, 128) * out_itemsize
    acc_block_bytes = _round_up(tb, 8) * _round_up(c, 128) * 4
    vmem_limit = 2 * in_block_bytes + 2 * out_block_bytes + acc_block_bytes + (4 << 20)
    vmem_limit = int(min(vmem_limit, vmem_capacity))

    kernel = functools.partial(
        _spoc_kernel,
        inv_hw=float(1.0 / hw),
        hw_total=hw,
        hw_chunk=hw_chunk,
        need_mask=need_mask,
    )

    out = pl.pallas_call(
        kernel,
        out_shape=jax.ShapeDtypeStruct((n, c), out_dtype),
        grid_spec=pltpu.PrefetchScalarGridSpec(
            num_scalar_prefetch=0,
            grid=grid,
            in_specs=[pl.BlockSpec((tb, c, hw_chunk), lambda i, k: (i, 0, k))],
            out_specs=pl.BlockSpec((tb, c), lambda i, k: (i, 0)),
            scratch_shapes=[pltpu.VMEM((tb, c), jnp.float32)],
        ),
        compiler_params=pltpu.CompilerParams(
            dimension_semantics=("parallel", "arbitrary"),
            vmem_limit_bytes=vmem_limit,
        ),
        cost_estimate=pl.CostEstimate(
            flops=n * c * hw,
            transcendentals=0,
            bytes_accessed=n * c * hw * itemsize + n * c * out_itemsize,
        ),
    )(x_flat)

    return out


def spoc_reference(x):
    # Pure-JAX reference: flatten(avg_pool2d(x, (H, W)), 1), f32 accumulation.
    return jnp.mean(x.astype(jnp.float32), axis=(-2, -1)).astype(x.dtype)


if __name__ == "__main__":
    key = jax.random.PRNGKey(0)
    # Small shapes consistent with the module's NCHW conv-feature input.
    x = jax.random.normal(key, (2, 4, 16, 16), dtype=jnp.float32)

    out = spoc_pallas(x)
    jax.block_until_ready(out)

    ref = spoc_reference(x)
    assert out.shape == (2, 4), out.shape
    assert out.dtype == x.dtype, out.dtype
    assert jnp.allclose(out.astype(jnp.float32), ref.astype(jnp.float32),
                        atol=1e-5, rtol=1e-5), "Pallas SPoC mismatch vs reference"

    # Extra coverage: ragged batch grid (N % TB != 0) and non-128 spatial size.
    x2 = jax.random.normal(jax.random.PRNGKey(1), (10, 8, 7, 7), dtype=jnp.float32)
    out2 = spoc_pallas(x2)
    jax.block_until_ready(out2)
    ref2 = spoc_reference(x2)
    assert out2.shape == (10, 8), out2.shape
    assert jnp.allclose(out2.astype(jnp.float32), ref2.astype(jnp.float32),
                        atol=1e-5, rtol=1e-5), "Pallas SPoC mismatch (ragged case)"

    print("KERNEL_OK")
</pallas_src>

<mosaic_0001>
module attributes {stable_mosaic.version = 11 : i64} {
  func.func @_spoc_kernel(%arg0: i32, %arg1: i32, %arg2: memref<2x4x256xf32, #tpu.memory_space<vmem>>, %arg3: memref<2x4xf32, #tpu.memory_space<vmem>>, %arg4: memref<2x4xf32, #tpu.memory_space<vmem>>) attributes {dimension_semantics = [#tpu.dimension_semantics<parallel>, #tpu.dimension_semantics<arbitrary>], iteration_bounds = array<i64: 1, 1>, scalar_prefetch = 0 : i64, scratch_operands = 1 : i64, tpu.core_type = #tpu.core_type<tc>, window_params = [{transform_indices = @transform_0, window_bounds = array<i64: 2, 4, 256>}, {transform_indices = @transform_1, window_bounds = array<i64: 2, 4>}]} {
    %c0_i32 = arith.constant 0 : i32
    %0 = arith.cmpi eq, %arg1, %c0_i32 : i32
    %1 = arith.extui %0 : i1 to i32
    %c0_i32_0 = arith.constant 0 : i32
    %2 = arith.cmpi ne, %1, %c0_i32_0 : i32
    scf.if %2 {
      %cst_9 = arith.constant 0.000000e+00 : f32
      %11 = vector.broadcast %cst_9 : f32 to vector<2x4xf32>
      %c0_10 = arith.constant 0 : index
      %c0_11 = arith.constant 0 : index
      %12 = vector.load %arg4[%c0_10, %c0_11] : memref<2x4xf32, #tpu.memory_space<vmem>>, vector<2x4xf32>
      tpu.vector_store %arg4[%c0_10, %c0_11], %11 {strides = array<i32>} : memref<2x4xf32, #tpu.memory_space<vmem>>, vector<2x4xf32>,
    } else {
    }
    %c0 = arith.constant 0 : index
    %c0_1 = arith.constant 0 : index
    %c0_2 = arith.constant 0 : index
    %3 = vector.load %arg2[%c0, %c0_1, %c0_2] : memref<2x4x256xf32, #tpu.memory_space<vmem>>, vector<2x4x256xf32>
    %c0_3 = arith.constant 0 : index
    %c0_4 = arith.constant 0 : index
    %4 = vector.load %arg4[%c0_3, %c0_4] : memref<2x4xf32, #tpu.memory_space<vmem>>, vector<2x4xf32>
    %cst = arith.constant dense<0.000000e+00> : vector<2x4xf32>
    %5 = vector.multi_reduction <add>, %3, %cst [2] : vector<2x4x256xf32> to vector<2x4xf32>
    %6 = arith.addf %4, %5 : vector<2x4xf32>
    %c0_5 = arith.constant 0 : index
    %c0_6 = arith.constant 0 : index
    %7 = vector.load %arg4[%c0_5, %c0_6] : memref<2x4xf32, #tpu.memory_space<vmem>>, vector<2x4xf32>
    tpu.vector_store %arg4[%c0_5, %c0_6], %6 {strides = array<i32>} : memref<2x4xf32, #tpu.memory_space<vmem>>, vector<2x4xf32>,
    %c0_i32_7 = arith.constant 0 : i32
    %8 = arith.cmpi eq, %arg1, %c0_i32_7 : i32
    %9 = arith.extui %8 : i1 to i32
    %c0_i32_8 = arith.constant 0 : i32
    %10 = arith.cmpi ne, %9, %c0_i32_8 : i32
    scf.if %10 {
      %c0_9 = arith.constant 0 : index
      %c0_10 = arith.constant 0 : index
      %11 = vector.load %arg4[%c0_9, %c0_10] : memref<2x4xf32, #tpu.memory_space<vmem>>, vector<2x4xf32>
      %cst_11 = arith.constant 3.906250e-03 : f32
      %12 = vector.broadcast %cst_11 : f32 to vector<2x4xf32>
      %13 = arith.mulf %11, %12 : vector<2x4xf32>
      %c0_12 = arith.constant 0 : index
      %c0_13 = arith.constant 0 : index
      %14 = vector.load %arg3[%c0_12, %c0_13] : memref<2x4xf32, #tpu.memory_space<vmem>>, vector<2x4xf32>
      tpu.vector_store %arg3[%c0_12, %c0_13], %13 {strides = array<i32>} : memref<2x4xf32, #tpu.memory_space<vmem>>, vector<2x4xf32>,
    } else {
    }
    return
  }
  func.func @transform_0(%arg0: i32, %arg1: i32) -> (i32, i32, i32) {
    %c0_i32 = arith.constant 0 : i32
    %c0_i32_0 = arith.constant 0 : i32
    return %arg0, %c0_i32, %arg1 : i32, i32, i32
  }
  func.func @transform_1(%arg0: i32, %arg1: i32) -> (i32, i32) {
    %c0_i32 = arith.constant 0 : i32
    %c0_i32_0 = arith.constant 0 : i32
    return %arg0, %c0_i32 : i32, i32
  }
}

</mosaic_0001>

<bundles_post_ra>
// kernel: tpu_custom_call.1
= control target key start
LH: loop header
LB: loop body
LE: loop exit
PB: predicated region body
PF: predicated region fallthrough
CT: control target
= control target key end

     0   :  { %6 = vsyncpa [#allocation4], 0  ;;  %s185_s0 = inlined_call_operand.hbm [shape: f32[2,4,256], index: 0, kind: input, shape index: {}]   ;;  %s186_s1 = inlined_call_operand.hbm [shape: f32[2,4], index: 1, kind: output, shape index: {}]  }
   0x1   :  { %7 = vsyncpa [#allocation5], 0  ;;  %s143_s6 = smov [#allocation3]   ;;  %s95_s10 = scalar_lea.hbm %s185_s0, 256 }
   0x2   :  { %s13_s7 = sshll.u32 %s143_s6, 4  ;;  %p96_p0 = scmp.ne.s32.totalorder %s185_s0, %s95_s10  ;;  %s14_s7 = int_to_ptr.vmem [resolvable:$true] %s13_s7 }
   0x3   :  { %p99_p1 = scmp.lt.u32.totalorder %s95_s10, %s185_s0 }
   0x5   :  { %p101_p2 = pnand %p99_p1, %p96_p0 }
   0x7   :  { %104 = shalt.err (!%p101_p2)
}
   0x8   :  { %s105_s15 = scalar_lea.vmem %s14_s7, 256  ;;  %p110_p4 = scmp.lt.s32.totalorder %s14_s7, %s14_s7 }
   0x9   :  { %p106_p3 = scmp.ne.s32.totalorder %s14_s7, %s105_s15  ;;  %p111_p5 = scmp.lt.s32.totalorder %s105_s15, %s105_s15 }
   0xb   :  { %p112_p6 = por %p111_p5, %p110_p4 }
   0xd   :  { %p113_p7 = pnand %p112_p6, %p106_p3 }
   0xf   :  { %116 = shalt.err (!%p113_p7)
}
  0x10   :  { %s144_s16 = smov 128   ;;  %s145_s17 = smov 8  }
  0x11   :  { %19 = dma.hbm_to_vmem [thread:$0]  %s185_s0, 256, %s14_s7, [#allocation4], %s144_s16, %s144_s16, %s145_s17  }
  0x12   :  { %139 = dma.done.wait [#allocation4], 256  }
  0x13   :  { %140 = vsyncadd [#allocation4], 4294967040  ;;  %vm38_vm0 = vcmask 1043456   ;;  %v29_v0 = vld [vmem:[#allocation3] sm:$0xff]  ;;  %v30_v1 = vld [vmem:[#allocation3 + $0x8] sm:$0xff]  ;;  %vm27_vm1 = vcmask 25600   ;;  %v51_v11 = vlaneseq }
  0x14   :  { %v34_v2 = vcombine.high %v29_v0, %v29_v0  ;;  %v39_v3 = vsel %vm38_vm0, %v29_v0, 0.0  ;;  %v35_v4 = vcombine.high %v30_v1, %v30_v1  ;;  %v44_v6 = vsel %vm38_vm0, %v30_v1, 0.0  ;;  %s147_s0 = smov [#allocation6]  }
  0x15   :  { %v146_v10 = vmov 0.0   ;;  %v52_v12 = vand.u32 127, %v51_v11  ;;  %v54_v13 = vshrl.u32 %v51_v11, 7  ;;  %vm61_vm2 = vcmask 1041409   ;;  %s79_s20 = sshll.u32 %s147_s0, 4  ;;  %s80_s20 = int_to_ptr.vmem [resolvable:$true] %s79_s20 }
  0x16   :  { %v40_v5 = vsel %vm38_vm0, %v34_v2, 0.0  ;;  %v45_v7 = vsel %vm38_vm0, %v35_v4, 0.0  ;;  %28 = vst.msk [vmem:[#allocation2] sm:$0x3] %vm27_vm1, %v146_v10  ;;  %s117_s21 = scalar_lea.vmem %s80_s20, 32  ;;  %p122_p9 = scmp.lt.s32.totalorder %s80_s20, %s80_s20 }
  0x17   :  { %v41_v8 = vadd.f32 %v40_v5, %v39_v3  ;;  %v46_v9 = vadd.f32 %v45_v7, %v44_v6  ;;  %v55_v15 = vsub.s32 %v52_v12, %v54_v13  ;;  %p118_p8 = scmp.ne.s32.totalorder %s80_s20, %s117_s21  ;;  %p123_p10 = scmp.lt.s32.totalorder %s117_s21, %s117_s21 }
  0x19   :  { %42 = vadd.xlane.f32.xlu0 %v41_v8  ;;  %p124_p11 = por %p123_p10, %p122_p9 }
  0x1b   :  { %p125_p12 = pnand %p124_p11, %p118_p8 }
  0x1d   :  { %47 = vadd.xlane.f32.xlu0 %v46_v9  ;;  %v31_v19 = vld [vmem:[#allocation2] sm:$0x3] }
  0xa6   :  { %v43_v14 = vpop.xlane.xlu0 %42 }
  0xa7   :  { %v56_v17 = vrot.slane %v43_v14, %v55_v15 }
  0xaa   :  { %v48_v16 = vpop.xlane.xlu0 %47 }
  0xab   :  { %v60_v18 = vrot.slane %v48_v16, %v55_v15 }
  0xad   :  { %v62_v20 = vsel %vm61_vm2, %v60_v18, %v56_v17 }
  0xae   :  { %v64_v21 = vadd.f32 %v62_v20, %v31_v19 }
  0xb0   :  { %66 = vst.msk [vmem:[#allocation2] sm:$0x3] %vm27_vm1, %v64_v21 }
  0xb7   :  { %v70_v22 = vld [vmem:[#allocation2] sm:$0x3] }
  0xb8   :  { %v71_v23 = vmul.f32 0.00390625, %v70_v22 }
  0xba   :  { %72 = vst.msk [vmem:[#allocation6] sm:$0x3] %vm27_vm1, %v71_v23 }
  0xbb   :  { %128 = shalt.err (!%p125_p12)
}
  0xbc   :  { %s129_s24 = scalar_lea.hbm %s186_s1, 32 }
  0xbd   :  { %p130_p13 = scmp.ne.s32.totalorder %s186_s1, %s129_s24  ;;  %p133_p0 = scmp.lt.u32.totalorder %s129_s24, %s186_s1 }
  0xbf   :  { %p135_p1 = pnand %p133_p0, %p130_p13 }
  0xc1   :  { %138 = shalt.err (!%p135_p1)
}
  0xc2   :  { %82 = dma.vmem_to_hbm [thread:$0]  %s80_s20, 32, %s186_s1, [#allocation5]  }
  0xc3   :  { %141 = dma.done.wait [#allocation5], 32  }
  0xc4   :  { %142 = vsyncadd [#allocation5], 4294967264 }
  0xc5   :  { %86 = vsyncpa [#allocation4], 1 }
  0xc6   :  { %87 = vsyncpa [#allocation5], 1 }

</bundles_post_ra>
